<compile_context>
chip_gen: v6e
topology: v6e:2x2x1
jax: 0.10.0
libtpu: 0.0.40
codegen_flags: <defaults>
</compile_context>

<pallas_src>
import functools

import jax
import jax.numpy as jnp
import numpy as np
from jax.experimental import pallas as pl
from jax.experimental.pallas import tpu as pltpu


def _round_up(x, m):
    return ((x + m - 1) // m) * m


# Conservative per-step VMEM budget (fits v5e's 16 MiB scoped default with the
# double-buffered output, input and the f32 intermediate).
_VMEM_BUDGET_BYTES = 12 * 1024 * 1024


def _choose_tile(B, tile_b, n_in, n_flat_pad, out_bytes):
    """Pick the batch tile: big enough to amortize per-step overhead, small
    enough for scoped VMEM, and producing >=2 grid steps when possible so both
    v7x TensorCores get work."""
    b8 = _round_up(B, 8)
    # Rough per-row VMEM footprint: 2x double-buffered output tile, f32
    # intermediate beta_flat, 2x double-buffered input tile.
    per_row = n_flat_pad * (2 * out_bytes + 4) + 2 * n_in * 4
    vmem_cap = max(8, (_VMEM_BUDGET_BYTES // per_row) // 8 * 8)
    tb = min(tile_b, vmem_cap, b8)
    if b8 <= tb and b8 > 8:
        # Split small/medium batches into (at least) two grid steps.
        tb = _round_up((b8 + 1) // 2, 8)
    return tb


# ----------------------------------------------------------------------------
# Kernel
# ----------------------------------------------------------------------------
def _make_beta_kernel(num_linear, threshold, inv_scale):
    """Kernel closed over the (static) MLP depth and hyper-params.

    Ref order: x, (W1t, b1), ..., (WLt, bL), P, bias_row, out
    """
    def kernel(*refs):
        x_ref = refs[0]
        out_ref = refs[-1]

        # ---- MLP sigma(x): Linear -> tanh -> ... -> Linear -----------------
        h = x_ref[...]                                   # (TB, n_in) f32
        widx = 1
        for i in range(num_linear):
            Wt = refs[widx][...]                         # (in_dim, out_dim)
            b = refs[widx + 1][...]                      # (1, out_dim)
            widx += 2
            h = jnp.dot(h, Wt, preferred_element_type=jnp.float32) + b
            if i < num_linear - 1:
                h = jnp.tanh(h)

        P = refs[widx][...]                              # (n_out, n_flat_pad)
        bias_row = refs[widx + 1][...]                   # (1, n_flat_pad)

        # ---- softplus(beta=1, threshold=20) / scale -------------------------
        # (the "+ margin" term and the residual identity are folded into
        #  bias_row in the wrapper)
        sp = jnp.where(h > threshold, h,
                       jnp.log1p(jnp.exp(jnp.minimum(h, threshold))))
        sig = sp * inv_scale                             # (TB, n_out)

        # ---- beta_flat[b, o*n_out + j] = sig[b, j] * M[o, j]  (+ bias) ------
        # Single lane-dense matmul: sig @ P -> (TB, n_flat_pad), last dim %128==0.
        beta_flat = jnp.dot(sig, P, preferred_element_type=jnp.float32)
        beta_flat = beta_flat + bias_row

        out_ref[...] = beta_flat.astype(out_ref.dtype)

    return kernel


# ----------------------------------------------------------------------------
# Wrapper
# ----------------------------------------------------------------------------
@functools.partial(jax.jit, static_argnames=("scale", "margin", "threshold",
                                             "use_residual", "tile_b",
                                             "out_dtype"))
def beta_layer_forward(x, mlp_weights, mlp_biases, U, V_weight, *,
                       scale=1.0, margin=0.01, threshold=20.0,
                       use_residual=False, tile_b=2048, out_dtype=None):
    """x: (B, n_in) -> beta: (B, n_out, n_out)."""
    B, n_in = x.shape
    n_out = U.shape[0]
    n_flat = n_out * n_out
    n_flat_pad = _round_up(n_flat, 128)      # keep output stores lane-dense
    out_dtype = x.dtype if out_dtype is None else jnp.dtype(out_dtype)
    out_bytes = jnp.dtype(out_dtype).itemsize

    tb = _choose_tile(B, tile_b, n_in, n_flat_pad, out_bytes)
    grid = (pl.cdiv(B, tb),)                 # ragged edge handled by Pallas

    # Algebraic fold:  beta[b,o,j] = sig[b,j] * M[o,j],  M = U @ V_weight.
    M = jnp.dot(U, V_weight, preferred_element_type=jnp.float32)     # (n_out, n_out)
    P = (jnp.eye(n_out, dtype=jnp.float32)[:, None, :] * M[None, :, :]
         ).reshape(n_out, n_flat)                                     # (n_out, n_out^2)
    # Constant row = (margin/scale)*M (from the "+margin" term) + optional eye.
    bias_row = (margin / scale) * M.reshape(1, n_flat)
    if use_residual:
        bias_row = bias_row + jnp.eye(n_out, dtype=jnp.float32).reshape(1, n_flat)
    if n_flat_pad != n_flat:
        pad = n_flat_pad - n_flat
        P = jnp.pad(P, ((0, 0), (0, pad)))
        bias_row = jnp.pad(bias_row, ((0, 0), (0, pad)))

    params = []
    in_specs = [pl.BlockSpec((tb, n_in), lambda i: (i, 0))]
    for W, b in zip(mlp_weights, mlp_biases):
        Wt = W.T                                         # (in_dim, out_dim)
        b2 = b.reshape(1, -1)
        params += [Wt, b2]
        in_specs += [pl.BlockSpec(Wt.shape, lambda i: (0, 0)),
                     pl.BlockSpec(b2.shape, lambda i: (0, 0))]
    params += [P, bias_row]
    in_specs += [pl.BlockSpec(P.shape, lambda i: (0, 0)),
                 pl.BlockSpec(bias_row.shape, lambda i: (0, 0))]

    kernel = _make_beta_kernel(len(mlp_weights), threshold, 1.0 / scale)

    out_flat = pl.pallas_call(
        kernel,
        out_shape=jax.ShapeDtypeStruct((B, n_flat_pad), out_dtype),
        grid=grid,
        in_specs=in_specs,
        out_specs=pl.BlockSpec((tb, n_flat_pad), lambda i: (i, 0)),
        compiler_params=pltpu.CompilerParams(
            dimension_semantics=("parallel",)),
    )(x, *params)

    if n_flat_pad != n_flat:
        out_flat = out_flat[:, :n_flat]
    return out_flat.reshape(B, n_out, n_out)


# ----------------------------------------------------------------------------
# Pure-JAX reference (mirrors the PyTorch forward)
# ----------------------------------------------------------------------------
def beta_layer_reference(x, mlp_weights, mlp_biases, U, V_weight, *,
                         scale=1.0, margin=0.01, threshold=20.0,
                         use_residual=False):
    h = x
    for i, (W, b) in enumerate(zip(mlp_weights, mlp_biases)):
        h = h @ W.T + b
        if i < len(mlp_weights) - 1:
            h = jnp.tanh(h)
    sp = jnp.where(h > threshold, h, jnp.log1p(jnp.exp(jnp.minimum(h, threshold))))
    sig = (sp + margin) / scale                          # (B, n_out)
    Vt = V_weight.T                                      # (n_out, n_in)
    mid = sig[:, :, None] * Vt[None]                     # (B, n_out, n_in)
    beta = jnp.einsum("ok,bjk->boj", U, mid)             # U @ mid[b].T
    if use_residual:
        beta = beta + jnp.eye(U.shape[0], dtype=beta.dtype)[None]
    return beta


# ----------------------------------------------------------------------------
# Main
# ----------------------------------------------------------------------------
if __name__ == "__main__":
    key = jax.random.PRNGKey(0)

    n_in, n_out = 8, 16
    hidden_layers = [32, 16]
    dims = [n_in] + hidden_layers + [n_out]

    keys = jax.random.split(key, 2 * len(hidden_layers) + 10)
    ki = iter(range(len(keys)))

    # MLP parameters (deterministic synthetic init, PyTorch Linear shapes (out, in)).
    mlp_weights, mlp_biases = [], []
    for din, dout in zip(dims[:-1], dims[1:]):
        bound = 1.0 / np.sqrt(din)
        W = jax.random.uniform(keys[next(ki)], (dout, din),
                               minval=-bound, maxval=bound, dtype=jnp.float32)
        b = jax.random.uniform(keys[next(ki)], (dout,),
                               minval=-bound, maxval=bound, dtype=jnp.float32)
        mlp_weights.append(W)
        mlp_biases.append(b)

    # Orthogonal U (n_out, n_in) and V.weight (n_in, n_out) via QR
    # (geotorch orthogonal parametrization stand-in).
    qU, _ = jnp.linalg.qr(jax.random.normal(keys[next(ki)], (n_out, n_in),
                                            dtype=jnp.float32))
    U = qU                                               # (n_out, n_in)
    qV, _ = jnp.linalg.qr(jax.random.normal(keys[next(ki)], (n_out, n_in),
                                            dtype=jnp.float32))
    V_weight = qV.T                                      # (n_in, n_out)

    mlp_weights = tuple(mlp_weights)
    mlp_biases = tuple(mlp_biases)

    # Case 1: B multiple of 8, no residual (exercises >=2 grid steps / megacore).
    x16 = jax.random.normal(keys[next(ki)], (16, n_in), dtype=jnp.float32)
    beta = jax.block_until_ready(
        beta_layer_forward(x16, mlp_weights, mlp_biases, U, V_weight,
                           scale=1.0, margin=0.01, threshold=20.0,
                           use_residual=False))
    ref = beta_layer_reference(x16, mlp_weights, mlp_biases, U, V_weight,
                               scale=1.0, margin=0.01, threshold=20.0,
                               use_residual=False)
    assert beta.shape == (16, n_out, n_out)
    np.testing.assert_allclose(np.asarray(beta), np.asarray(ref),
                               rtol=1e-5, atol=1e-5)

    # Case 2: ragged batch (exercises partial boundary block) + residual identity.
    x13 = jax.random.normal(keys[next(ki)], (13, n_in), dtype=jnp.float32)
    beta_r = jax.block_until_ready(
        beta_layer_forward(x13, mlp_weights, mlp_biases, U, V_weight,
                           scale=2.0, margin=0.01, threshold=20.0,
                           use_residual=True))
    ref_r = beta_layer_reference(x13, mlp_weights, mlp_biases, U, V_weight,
                                 scale=2.0, margin=0.01, threshold=20.0,
                                 use_residual=True)
    assert beta_r.shape == (13, n_out, n_out)
    np.testing.assert_allclose(np.asarray(beta_r), np.asarray(ref_r),
                               rtol=1e-5, atol=1e-5)

    # Case 3: optional bf16 output (halves dominant HBM writeback), loose tol.
    beta_bf16 = jax.block_until_ready(
        beta_layer_forward(x16, mlp_weights, mlp_biases, U, V_weight,
                           scale=1.0, margin=0.01, threshold=20.0,
                           use_residual=False, out_dtype=jnp.bfloat16))
    assert beta_bf16.dtype == jnp.bfloat16
    np.testing.assert_allclose(np.asarray(beta_bf16, dtype=np.float32),
                               np.asarray(ref), rtol=2e-2, atol=2e-2)

    print("KERNEL_OK")
</pallas_src>

<mosaic_0001>
module attributes {stable_mosaic.version = 11 : i64} {
  func.func @kernel(%arg0: i32, %arg1: memref<8x8xf32, #tpu.memory_space<vmem>>, %arg2: memref<8x32xf32, #tpu.memory_space<vmem>>, %arg3: memref<1x32xf32, #tpu.memory_space<vmem>>, %arg4: memref<32x16xf32, #tpu.memory_space<vmem>>, %arg5: memref<1x16xf32, #tpu.memory_space<vmem>>, %arg6: memref<16x16xf32, #tpu.memory_space<vmem>>, %arg7: memref<1x16xf32, #tpu.memory_space<vmem>>, %arg8: memref<16x256xf32, #tpu.memory_space<vmem>>, %arg9: memref<1x256xf32, #tpu.memory_space<vmem>>, %arg10: memref<8x256xf32, #tpu.memory_space<vmem>>) attributes {dimension_semantics = [#tpu.dimension_semantics<parallel>], iteration_bounds = array<i64: 2>, scalar_prefetch = 0 : i64, scratch_operands = 0 : i64, tpu.core_type = #tpu.core_type<tc>, window_params = [{transform_indices = @transform_0, window_bounds = array<i64: 8, 8>}, {pipeline_mode = #tpu.pipeline_mode<synchronous>, transform_indices = @transform_1, window_bounds = array<i64: 8, 32>}, {pipeline_mode = #tpu.pipeline_mode<synchronous>, transform_indices = @transform_2, window_bounds = array<i64: 1, 32>}, {pipeline_mode = #tpu.pipeline_mode<synchronous>, transform_indices = @transform_3, window_bounds = array<i64: 32, 16>}, {pipeline_mode = #tpu.pipeline_mode<synchronous>, transform_indices = @transform_4, window_bounds = array<i64: 1, 16>}, {pipeline_mode = #tpu.pipeline_mode<synchronous>, transform_indices = @transform_5, window_bounds = array<i64: 16, 16>}, {pipeline_mode = #tpu.pipeline_mode<synchronous>, transform_indices = @transform_6, window_bounds = array<i64: 1, 16>}, {pipeline_mode = #tpu.pipeline_mode<synchronous>, transform_indices = @transform_7, window_bounds = array<i64: 16, 256>}, {pipeline_mode = #tpu.pipeline_mode<synchronous>, transform_indices = @transform_8, window_bounds = array<i64: 1, 256>}, {transform_indices = @transform_9, window_bounds = array<i64: 8, 256>}]} {
    %c0 = arith.constant 0 : index
    %c0_0 = arith.constant 0 : index
    %0 = vector.load %arg1[%c0, %c0_0] : memref<8x8xf32, #tpu.memory_space<vmem>>, vector<8x8xf32>
    %c0_1 = arith.constant 0 : index
    %c0_2 = arith.constant 0 : index
    %1 = vector.load %arg2[%c0_1, %c0_2] : memref<8x32xf32, #tpu.memory_space<vmem>>, vector<8x32xf32>
    %c0_3 = arith.constant 0 : index
    %c0_4 = arith.constant 0 : index
    %2 = vector.load %arg3[%c0_3, %c0_4] : memref<1x32xf32, #tpu.memory_space<vmem>>, vector<1x32xf32>
    %cst = arith.constant dense<0.000000e+00> : vector<8x32xf32>
    %3 = tpu.matmul %0, %1, %cst {dimension_numbers = #tpu.dot_dimension_numbers<[1], [0], [0], [1], [0, 0, 1, 1], [], []>} : vector<8x8xf32>, vector<8x32xf32>, vector<8x32xf32> -> vector<8x32xf32>
    %4 = vector.broadcast %2 : vector<1x32xf32> to vector<8x32xf32>
    %5 = arith.addf %3, %4 : vector<8x32xf32>
    %6 = math.tanh %5 : vector<8x32xf32>
    %c0_5 = arith.constant 0 : index
    %c0_6 = arith.constant 0 : index
    %7 = vector.load %arg4[%c0_5, %c0_6] : memref<32x16xf32, #tpu.memory_space<vmem>>, vector<32x16xf32>
    %c0_7 = arith.constant 0 : index
    %c0_8 = arith.constant 0 : index
    %8 = vector.load %arg5[%c0_7, %c0_8] : memref<1x16xf32, #tpu.memory_space<vmem>>, vector<1x16xf32>
    %cst_9 = arith.constant dense<0.000000e+00> : vector<8x16xf32>
    %9 = tpu.matmul %6, %7, %cst_9 {dimension_numbers = #tpu.dot_dimension_numbers<[1], [0], [0], [1], [0, 0, 1, 1], [], []>} : vector<8x32xf32>, vector<32x16xf32>, vector<8x16xf32> -> vector<8x16xf32>
    %10 = vector.broadcast %8 : vector<1x16xf32> to vector<8x16xf32>
    %11 = arith.addf %9, %10 : vector<8x16xf32>
    %12 = math.tanh %11 : vector<8x16xf32>
    %c0_10 = arith.constant 0 : index
    %c0_11 = arith.constant 0 : index
    %13 = vector.load %arg6[%c0_10, %c0_11] : memref<16x16xf32, #tpu.memory_space<vmem>>, vector<16x16xf32>
    %c0_12 = arith.constant 0 : index
    %c0_13 = arith.constant 0 : index
    %14 = vector.load %arg7[%c0_12, %c0_13] : memref<1x16xf32, #tpu.memory_space<vmem>>, vector<1x16xf32>
    %cst_14 = arith.constant dense<0.000000e+00> : vector<8x16xf32>
    %15 = tpu.matmul %12, %13, %cst_14 {dimension_numbers = #tpu.dot_dimension_numbers<[1], [0], [0], [1], [0, 0, 1, 1], [], []>} : vector<8x16xf32>, vector<16x16xf32>, vector<8x16xf32> -> vector<8x16xf32>
    %16 = vector.broadcast %14 : vector<1x16xf32> to vector<8x16xf32>
    %17 = arith.addf %15, %16 : vector<8x16xf32>
    %c0_15 = arith.constant 0 : index
    %c0_16 = arith.constant 0 : index
    %18 = vector.load %arg8[%c0_15, %c0_16] : memref<16x256xf32, #tpu.memory_space<vmem>>, vector<16x256xf32>
    %c0_17 = arith.constant 0 : index
    %c0_18 = arith.constant 0 : index
    %19 = vector.load %arg9[%c0_17, %c0_18] : memref<1x256xf32, #tpu.memory_space<vmem>>, vector<1x256xf32>
    %cst_19 = arith.constant 2.000000e+01 : f32
    %20 = vector.broadcast %cst_19 : f32 to vector<8x16xf32>
    %21 = arith.cmpf ogt, %17, %20 : vector<8x16xf32>
    %cst_20 = arith.constant 2.000000e+01 : f32
    %22 = vector.broadcast %cst_20 : f32 to vector<8x16xf32>
    %23 = arith.minimumf %17, %22 : vector<8x16xf32>
    %24 = math.exp %23 : vector<8x16xf32>
    %25 = math.log1p %24 : vector<8x16xf32>
    %26 = arith.select %21, %17, %25 : vector<8x16xi1>, vector<8x16xf32>
    %cst_21 = arith.constant 1.000000e+00 : f32
    %27 = vector.broadcast %cst_21 : f32 to vector<8x16xf32>
    %28 = arith.mulf %26, %27 : vector<8x16xf32>
    %cst_22 = arith.constant dense<0.000000e+00> : vector<8x256xf32>
    %29 = tpu.matmul %28, %18, %cst_22 {dimension_numbers = #tpu.dot_dimension_numbers<[1], [0], [0], [1], [0, 0, 1, 1], [], []>} : vector<8x16xf32>, vector<16x256xf32>, vector<8x256xf32> -> vector<8x256xf32>
    %30 = vector.broadcast %19 : vector<1x256xf32> to vector<8x256xf32>
    %31 = arith.addf %29, %30 : vector<8x256xf32>
    %c0_23 = arith.constant 0 : index
    %c0_24 = arith.constant 0 : index
    %32 = vector.load %arg10[%c0_23, %c0_24] : memref<8x256xf32, #tpu.memory_space<vmem>>, vector<8x256xf32>
    tpu.vector_store %arg10[%c0_23, %c0_24], %31 {strides = array<i32>} : memref<8x256xf32, #tpu.memory_space<vmem>>, vector<8x256xf32>,
    return
  }
  func.func @transform_0(%arg0: i32) -> (i32, i32) {
    %c0_i32 = arith.constant 0 : i32
    %c0_i32_0 = arith.constant 0 : i32
    return %arg0, %c0_i32 : i32, i32
  }
  func.func @transform_1(%arg0: i32) -> (i32, i32) {
    %c0_i32 = arith.constant 0 : i32
    %c0_i32_0 = arith.constant 0 : i32
    %c0_i32_1 = arith.constant 0 : i32
    return %c0_i32, %c0_i32_0 : i32, i32
  }
  func.func @transform_2(%arg0: i32) -> (i32, i32) {
    %c0_i32 = arith.constant 0 : i32
    %c0_i32_0 = arith.constant 0 : i32
    %c0_i32_1 = arith.constant 0 : i32
    return %c0_i32, %c0_i32_0 : i32, i32
  }
  func.func @transform_3(%arg0: i32) -> (i32, i32) {
    %c0_i32 = arith.constant 0 : i32
    %c0_i32_0 = arith.constant 0 : i32
    %c0_i32_1 = arith.constant 0 : i32
    return %c0_i32, %c0_i32_0 : i32, i32
  }
  func.func @transform_4(%arg0: i32) -> (i32, i32) {
    %c0_i32 = arith.constant 0 : i32
    %c0_i32_0 = arith.constant 0 : i32
    %c0_i32_1 = arith.constant 0 : i32
    return %c0_i32, %c0_i32_0 : i32, i32
  }
  func.func @transform_5(%arg0: i32) -> (i32, i32) {
    %c0_i32 = arith.constant 0 : i32
    %c0_i32_0 = arith.constant 0 : i32
    %c0_i32_1 = arith.constant 0 : i32
    return %c0_i32, %c0_i32_0 : i32, i32
  }
  func.func @transform_6(%arg0: i32) -> (i32, i32) {
    %c0_i32 = arith.constant 0 : i32
    %c0_i32_0 = arith.constant 0 : i32
    %c0_i32_1 = arith.constant 0 : i32
    return %c0_i32, %c0_i32_0 : i32, i32
  }
  func.func @transform_7(%arg0: i32) -> (i32, i32) {
    %c0_i32 = arith.constant 0 : i32
    %c0_i32_0 = arith.constant 0 : i32
    %c0_i32_1 = arith.constant 0 : i32
    return %c0_i32, %c0_i32_0 : i32, i32
  }
  func.func @transform_8(%arg0: i32) -> (i32, i32) {
    %c0_i32 = arith.constant 0 : i32
    %c0_i32_0 = arith.constant 0 : i32
    %c0_i32_1 = arith.constant 0 : i32
    return %c0_i32, %c0_i32_0 : i32, i32
  }
  func.func @transform_9(%arg0: i32) -> (i32, i32) {
    %c0_i32 = arith.constant 0 : i32
    %c0_i32_0 = arith.constant 0 : i32
    return %arg0, %c0_i32 : i32, i32
  }
}

</mosaic_0001>

<bundles_post_ra>
// kernel: beta_layer_forward.1
= control target key start
LH: loop header
LB: loop body
LE: loop exit
PB: predicated region body
PF: predicated region fallthrough
CT: control target
= control target key end

     0   :  { %s873_s30 = smov 0   ;;  %s941_s0 = inlined_call_operand.vmem [shape: f32[16,8], index: 0, kind: input, shape index: {}]   ;;  %s942_s1 = inlined_call_operand.vmem [shape: f32[8,32], index: 1, kind: input, shape index: {}]   ;;  %s943_s2 = inlined_call_operand.vmem [shape: f32[1,32], index: 2, kind: input, shape index: {}]   ;;  %s944_s3 = inlined_call_operand.vmem [shape: f32[32,16], index: 3, kind: input, shape index: {}]   ;;  %s945_s4 = inlined_call_operand.vmem [shape: f32[1,16], index: 4, kind: input, shape index: {}]   ;;  %s946_s5 = inlined_call_operand.vmem [shape: f32[16,16], index: 5, kind: input, shape index: {}]   ;;  %s947_s6 = inlined_call_operand.vmem [shape: f32[1,16], index: 6, kind: input, shape index: {}]   ;;  %s948_s7 = inlined_call_operand.vmem [shape: f32[16,256], index: 7, kind: input, shape index: {}]   ;;  %s949_s8 = inlined_call_operand.vmem [shape: f32[1,256], index: 8, kind: input, shape index: {}]   ;;  %s950_s9 = inlined_call_operand.vmem [shape: f32[16,256], index: 9, kind: output, shape index: {}]  }
   0x1 LB: > { %s744_s10 = sadd.s32 4294967295, %s819_s30   ;;  %p748_p0 = scmp.ge.s32.totalorder %s819_s30, 1  ;;  %s819_s30 = sphi %s873_s30, %s19_s30  }
   0x2   : > { %p286_p1 = scmp.lt.s32.totalorder %s819_s30, 3 }
   0x4   : > { %p287_p2 = pnand %p748_p0, %p286_p1 }
   0x5   : > { %p321_p3 = scmp.lt.s32.totalorder (!%p287_p2), %s744_s10, 1 }
   0x6   : > { %290 = sbr.rel (%p287_p2) target bundleno = 864 (0x360), region = 56 }
   0xb   : > { %v331_v0 = vld [vmem:[%s942_s1] sm:$0xff]  ;;  %v821_v1 = vmov 0.0   ;;  %vm822_vm0 = vmmov 0   ;;  %s952_s10 = smov (!%p321_p3, %s744_s10), 1  ;;  %vm339_vm1 = vcmask 64512   ;;  %v417_v3 = vld [vmem:[%s944_s3 + $0x18] sm:$0xff]  ;;  %v603_v39 = vlaneseq }
   0xc   : > { %772 = vmatprep.subr.mxu0 %v821_v1  ;;  %774 = vmatprep.mubr.msk.f32.mxu0 %vm822_vm0, %v821_v1  ;;  %s749_s13 = sshll.u32 %s952_s10, 3  ;;  %v416_v4 = vld [vmem:[%s944_s3 + $0x10] sm:$0xff]  ;;  %v415_v5 = vld [vmem:[%s944_s3 + $0x8] sm:$0xff]  ;;  %v414_v6 = vld [vmem:[%s944_s3] sm:$0xff]  ;;  %vm425_vm2 = vcmask 261120   ;;  %vm509_vm3 = vcmask 130048  }
   0xd   : > { %773 = vmatpush3.msra.mxu0 %v331_v0  ;;  %777 = vmatprep.subr.mxu1 %v821_v1  ;;  %s324_s16 = scalar_lea.vmem %s941_s0, %s749_s13  ;;  %v752_v7 = vld [vmem:[%s943_s2] ss:$0 sm:$0xff]  ;;  %v501_v12 = vld [vmem:[%s946_s5 + $0x8] sm:$0xff]  ;;  %v586_v19 = vld [vmem:[%s948_s7 + $0x18] sm:$0xff]  ;;  %v604_v40 = vshrl.u32 %v603_v39, 7  ;;  %s761_s26 = sshll.u32 %s952_s10, 4 }
   0xe   : > { %785 = vmatprep.mubr.msk.f32.mxu1 %vm822_vm0, %v821_v1  ;;  %788 = vmatprep.subr.mxu0 %v821_v1  ;;  %v330_v2 = vld [vmem:[%s324_s16] sm:$0xff]  ;;  %v585_v20 = vld [vmem:[%s948_s7 + $0x10] sm:$0xff]  ;;  %v584_v21 = vld [vmem:[%s948_s7 + $0x8] sm:$0xff]  ;;  %s329_s29 = scalar_lea.vmem %s950_s9, %s761_s26 }
   0xf   : > { %775 = vmatmul.mubr.msk.f32.vlgmr.msra.gmra.mxu0 %vm339_vm1, %v330_v2  ;;  %778 = vmatpush3.msra.mxu1 %v417_v3  ;;  %v500_v13 = vld [vmem:[%s946_s5] sm:$0xff]  ;;  %v605_v41 = vsub.s32 0, %v604_v40  ;;  %v609_v43 = vsub.s32 1, %v604_v40 }
  0x10   : > { %792 = vmatprep.mubr.msk.f32.mxu0 %vm822_vm0, %v821_v1  ;;  %779 = vmatprep.subr.mxu1 %v821_v1  ;;  %v754_v14 = vld [vmem:[%s945_s4] ss:$0 sm:$0xff] }
  0x11   : > { %780 = vmatpush3.msra.mxu1 %v416_v4  ;;  %789 = vmatpush3.msra.mxu0 %v501_v12  ;;  %v583_v22 = vld [vmem:[%s948_s7] sm:$0xff] }
  0x12   : > { %781 = vmatprep.subr.mxu1 %v821_v1  ;;  %790 = vmatprep.subr.mxu0 %v821_v1  ;;  %v756_v23 = vld [vmem:[%s947_s6] ss:$0 sm:$0xff] }
  0x13   : > { %782 = vmatpush3.msra.mxu1 %v415_v5  ;;  %791 = vmatpush3.msra.mxu0 %v500_v13  ;;  %v587_v42 = vld [vmem:[%s949_s8] sm:$0x3] }
  0x14   : > { %783 = vmatprep.subr.mxu1 %v821_v1  ;;  %644 = vmatprep.subr.mxu0 %v586_v19  ;;  %v606_v44 = vrot.slane %v587_v42, %v605_v41  ;;  %v610_v45 = vrot.slane %v587_v42, %v609_v43 }
  0x15   : > { %784 = vmatpush3.msra.mxu1 %v414_v6 }
  0xcf   : > { %v409_v8 = vpop.f32.mrf.mxu0 }
  0xd0   : > { %v410_v9 = vadd.f32 %v752_v7, %v409_v8 }
  0xd1   : > { %v776_v10 = vpop.f32.mrf.mxu0 }
  0xd2   : > { %805 = vtanh.f32 %v410_v9 }
  0xdf   : > { %v806_v11 = vpop.eup %805 }
  0xe0   : > { %786 = vmatmul.mubr.msk.f32.vlgmr.msra.gmra.mxu1 %vm425_vm2, %v806_v11 }
 0x1a0   : > { %v495_v15 = vpop.f32.mrf.mxu1 }
 0x1a1   : > { %v496_v16 = vadd.f32 %v754_v14, %v495_v15 }
 0x1a2   : > { %v787_v17 = vpop.f32.mrf.mxu1 }
 0x1a3   : > { %807 = vtanh.f32 %v496_v16 }
 0x1b0   : > { %v808_v18 = vpop.eup %807 }
 0x1b1   : > { %793 = vmatmul.mubr.msk.f32.vlgmr.msra.gmra.mxu0 %vm509_vm3, %v808_v18 }
 0x1b2   : > { %680 = vmatprep.mubr.f32.mxu0 %v821_v1  ;;  %645 = vmatpush1.msra.mxu0 %v585_v20 }
 0x1b3   : > { %646 = vmatprep.subr.mxu0 %v584_v21 }
 0x1b4   : > { %647 = vmatpush1.msra.mxu0 %v583_v22 }
 0x271   : > { %v579_v24 = vpop.f32.mrf.mxu0 }
 0x272   : > { %v580_v25 = vadd.f32 %v756_v23, %v579_v24 }
 0x273   : > { %v794_v26 = vpop.f32.mrf.mxu0 }
 0x274   : > { %v589_v27 = vmin.f32 %v580_v25, 20.0  ;;  %vm588_vm5 = vcmp.gt.f32.partialorder %v580_v25, 20.0 }
 0x276   : > { %v590_v28 = vmul.f32 1.442695, %v589_v27 }
 0x278   : > { %809 = vpow2.f32 %v590_v28 }
 0x285   : > { %v810_v29 = vpop.eup %809 }
 0x286   : > { %v592_v30 = vadd.f32 1.0, %v810_v29  ;;  %v595_v31 = vmul.f32 -0.5, %v810_v29  ;;  %v598_v33 = vand.u32 2147483647, %v810_v29 }
 0x288   : > { %811 = vlog2.f32 %v592_v30  ;;  %v596_v32 = vadd.f32 1.0, %v595_v31  ;;  %vm599_vm4 = vcmp.lt.f32.partialorder %v598_v33, 0.0004427343 }
 0x28a   : > { %v597_v36 = vmul.f32 %v810_v29, %v596_v32 }
 0x295   : > { %v812_v34 = vpop.eup %811 }
 0x296   : > { %v594_v35 = vmul.f32 0.6931472, %v812_v34 }
 0x298   : > { %v600_v37 = vsel %vm599_vm4, %v597_v36, %v594_v35 }
 0x299   : > { %v601_v38 = vsel %vm588_vm5, %v580_v25, %v600_v37 }
 0x29a   : > { %758 = vmatmul.mubr.msk.f32.vlgmr.msra.gmra.mxu0 %vm509_vm3, %v601_v38 }
 0x35a   : > { %v682_v46 = vpop.f32.mrf.mxu0 }
 0x35b   : > { %v683_v47 = vadd.f32 %v682_v46, %v606_v44 }
 0x35c   : > { %v684_v48 = vpop.f32.mrf.mxu0 }
 0x35d   : > { %687 = vst [vmem:[%s329_s29] sm:$0xff] %v683_v47  ;;  %v685_v49 = vadd.f32 %v684_v48, %v610_v45 }
 0x35f   : > { %688 = vst [vmem:[%s329_s29 + $0x8] sm:$0xff] %v685_v49 }
 0x360 PF: > { %s19_s30 = sadd.s32 1, %s819_s30  }
 0x361   : > { %p16_p4 = scmp.ge.s32.totalorder %s19_s30, 4  }
 0x363   :  { %18 = sbr.rel (!%p16_p4) target bundleno = 1 (0x1), region = 86 }

</bundles_post_ra>
